<compile_context>
chip_gen: v7x
topology: tpu7x:2x2x1
jax: 0.10.0
libtpu: 0.0.40
codegen_flags: <defaults>
</compile_context>

<pallas_src>
import jax
import jax.numpy as jnp
from jax.experimental import pallas as pl
from jax.experimental.pallas import tpu as pltpu


def _gated_fusion_kernel(att_ref, conv_ref, dwa_ref, dwc_ref, db_ref, out_ref):
    att = att_ref[...]                       # (C, tile_hw), original dtype
    conv = conv_ref[...]                     # (C, tile_hw)

    att_f = att.astype(jnp.float32)
    conv_f = conv.astype(jnp.float32)

    # Gate logit difference, one fused sublane (XLU) reduce over C.
    d = jnp.sum(att_f * dwa_ref[...] + conv_f * dwc_ref[...],
                axis=0, keepdims=True) + db_ref[...]          # (1, tile_hw) f32

    # 2-way softmax over the gate channels == sigmoid of the difference (EUP).
    g_att = 1.0 / (1.0 + jnp.exp(-d))

    # Single-multiply blend: fused = conv + g_att * (att - conv).
    fused = conv_f + g_att * (att_f - conv_f)

    # Slab-aligned stores: [fused | att | conv] along the size-3 axis.
    out_ref[0, :, :] = fused.astype(out_ref.dtype)
    out_ref[1, :, :] = att.astype(out_ref.dtype)
    out_ref[2, :, :] = conv.astype(out_ref.dtype)


def _vmem_budget_and_limit():
    """Generation-aware tile budget and compiler scoped-VMEM limit (bytes)."""
    try:
        phys = pltpu.get_tpu_info().vmem_capacity_bytes
    except Exception:
        phys = 64 * 1024 * 1024          # conservative: v7x per-core VMEM
    # 16 MiB on v7x (64 MiB physical), 24 MiB on v5e/v6e (128 MiB physical).
    budget = min(phys // 4, 24 * 1024 * 1024)
    limit = min(phys // 2, 2 * budget)   # headroom for double-buffering etc.
    return budget, limit


def _pick_tile_hw(hw, c, itemsize, budget_bytes, batch):
    """Largest 128-aligned lane tile over H*W that fits the VMEM budget."""
    if hw <= 128:
        # Full-extent block is always legal, even when hw % 128 != 0.
        return hw
    # Per-lane bytes: double-buffered streaming slabs (2C in + 3C out) plus
    # ~4C f32 live temporaries (att_f, conv_f, diff, reduce operand).
    per_lane_bytes = 2 * 5 * c * itemsize + 4 * c * 4
    max_tile = max(128, (budget_bytes // per_lane_bytes) // 128 * 128)
    hw_padded = pl.cdiv(hw, 128) * 128
    tile = min(hw_padded, max_tile)
    # Keep >= 2 grid points in total so both TensorCores (v7x) get work even
    # for batch-1 inputs.
    if batch < 2 and tile >= hw:
        tile = max(128, pl.cdiv(pl.cdiv(hw, 2), 128) * 128)
    return tile


def gated_fusion(att_feat, conv_feat, weight, bias, *, vmem_budget_bytes=None):
    """att_feat, conv_feat: (B, C, H, W).  weight: (2, 2C, 1, 1), bias: (2,)."""
    B, C, H, W = att_feat.shape
    HW = H * W

    # NCHW -> (B, C, HW): pure reshape (no transpose / extra HBM pass).
    att3 = att_feat.reshape(B, C, HW)
    conv3 = conv_feat.reshape(B, C, HW)

    # Conv2d(2C, 2, 1) weight (2, 2C, 1, 1).  The softmax gate only needs the
    # logit difference, so precompute delta-weights and delta-bias.
    w = weight.reshape(2, 2 * C).astype(jnp.float32)
    dw = w[0] - w[1]                               # (2C,)
    dwa = dw[:C].reshape(C, 1)                     # applied to att channels
    dwc = dw[C:].reshape(C, 1)                     # applied to conv channels
    db = (bias[0] - bias[1]).astype(jnp.float32).reshape(1, 1)

    budget, vmem_limit = _vmem_budget_and_limit()
    if vmem_budget_bytes is not None:
        budget = int(vmem_budget_bytes)
        vmem_limit = max(vmem_limit, 2 * budget)

    itemsize = jnp.dtype(att_feat.dtype).itemsize
    tile_hw = _pick_tile_hw(HW, C, itemsize, budget, B)
    grid = (B, pl.cdiv(HW, tile_hw))

    out = pl.pallas_call(
        _gated_fusion_kernel,
        out_shape=jax.ShapeDtypeStruct((B, 3, C, HW), att_feat.dtype),
        grid_spec=pltpu.PrefetchScalarGridSpec(
            num_scalar_prefetch=0,
            grid=grid,
            in_specs=[
                pl.BlockSpec((None, C, tile_hw), lambda b, i: (b, 0, i)),
                pl.BlockSpec((None, C, tile_hw), lambda b, i: (b, 0, i)),
                pl.BlockSpec((C, 1), lambda b, i: (0, 0)),
                pl.BlockSpec((C, 1), lambda b, i: (0, 0)),
                pl.BlockSpec((1, 1), lambda b, i: (0, 0)),
            ],
            out_specs=pl.BlockSpec((None, 3, C, tile_hw),
                                   lambda b, i: (b, 0, 0, i)),
        ),
        compiler_params=pltpu.CompilerParams(
            dimension_semantics=("parallel", "parallel"),
            vmem_limit_bytes=int(vmem_limit),
        ),
    )(att3, conv3, dwa, dwc, db)

    # (B, 3, C, HW) -> (B, 3C, H, W): pure reshape (adjacent dims merge).
    return out.reshape(B, 3 * C, H, W)


def _reference(att_feat, conv_feat, weight, bias):
    """Pure-JAX reference replicating the PyTorch forward."""
    fusion_input = jnp.concatenate([att_feat, conv_feat], axis=1)   # (B, 2C, H, W)
    w = weight.reshape(2, -1)                                        # (2, 2C)
    logits = jnp.einsum("bchw,oc->bohw", fusion_input, w) + bias[None, :, None, None]
    gates = jax.nn.softmax(logits, axis=1)
    g_att, g_conv = gates[:, 0:1], gates[:, 1:2]
    fused = g_att * att_feat + g_conv * conv_feat
    return jnp.concatenate([fused, att_feat, conv_feat], axis=1)


def _run_case(key, B, C, H, W):
    k1, k2, k3, k4 = jax.random.split(key, 4)
    att = jax.random.normal(k1, (B, C, H, W), dtype=jnp.float32)
    conv = jax.random.normal(k2, (B, C, H, W), dtype=jnp.float32)
    weight = 0.1 * jax.random.normal(k3, (2, 2 * C, 1, 1), dtype=jnp.float32)
    bias = 0.1 * jax.random.normal(k4, (2,), dtype=jnp.float32)

    out = gated_fusion(att, conv, weight, bias)
    out = jax.block_until_ready(out)

    ref = _reference(att, conv, weight, bias)
    assert out.shape == (B, 3 * C, H, W)
    assert jnp.allclose(out, ref, atol=1e-5, rtol=1e-5)


if __name__ == "__main__":
    key = jax.random.PRNGKey(0)
    k_a, k_b = jax.random.split(key, 2)

    # Primary case: B=2, C=4, 16x16 (128-divisible HW).
    _run_case(k_a, 2, 4, 16, 16)

    # Secondary case: batch-1, C not a multiple of 8, ragged HW (180 lanes)
    # exercising the masked last block and the 2-tile-minimum HW split.
    _run_case(k_b, 1, 3, 12, 15)

    print("KERNEL_OK")
</pallas_src>

<mosaic_0001>
module attributes {stable_mosaic.version = 11 : i64} {
  func.func @_gated_fusion_kernel(%arg0: i32, %arg1: i32, %arg2: memref<1x4x256xf32, #tpu.memory_space<vmem>>, %arg3: memref<1x4x256xf32, #tpu.memory_space<vmem>>, %arg4: memref<4x1xf32, #tpu.memory_space<vmem>>, %arg5: memref<4x1xf32, #tpu.memory_space<vmem>>, %arg6: memref<1x1xf32, #tpu.memory_space<vmem>>, %arg7: memref<1x3x4x256xf32, #tpu.memory_space<vmem>>) attributes {dimension_semantics = [#tpu.dimension_semantics<parallel>, #tpu.dimension_semantics<parallel>], iteration_bounds = array<i64: 2, 1>, scalar_prefetch = 0 : i64, scratch_operands = 0 : i64, tpu.core_type = #tpu.core_type<tc>, window_params = [{transform_indices = @transform_0, window_bounds = array<i64: 1, 4, 256>}, {transform_indices = @transform_1, window_bounds = array<i64: 1, 4, 256>}, {pipeline_mode = #tpu.pipeline_mode<synchronous>, transform_indices = @transform_2, window_bounds = array<i64: 4, 1>}, {pipeline_mode = #tpu.pipeline_mode<synchronous>, transform_indices = @transform_3, window_bounds = array<i64: 4, 1>}, {pipeline_mode = #tpu.pipeline_mode<synchronous>, transform_indices = @transform_4, window_bounds = array<i64: 1, 1>}, {transform_indices = @transform_5, window_bounds = array<i64: 1, 3, 4, 256>}]} {
    %c0 = arith.constant 0 : index
    %c0_0 = arith.constant 0 : index
    %c0_1 = arith.constant 0 : index
    %0 = vector.load %arg2[%c0, %c0_0, %c0_1] : memref<1x4x256xf32, #tpu.memory_space<vmem>>, vector<1x4x256xf32>
    %1 = vector.shape_cast %0 : vector<1x4x256xf32> to vector<4x256xf32>
    %c0_2 = arith.constant 0 : index
    %c0_3 = arith.constant 0 : index
    %c0_4 = arith.constant 0 : index
    %2 = vector.load %arg3[%c0_2, %c0_3, %c0_4] : memref<1x4x256xf32, #tpu.memory_space<vmem>>, vector<1x4x256xf32>
    %3 = vector.shape_cast %2 : vector<1x4x256xf32> to vector<4x256xf32>
    %c0_5 = arith.constant 0 : index
    %c0_6 = arith.constant 0 : index
    %4 = vector.load %arg4[%c0_5, %c0_6] : memref<4x1xf32, #tpu.memory_space<vmem>>, vector<4x1xf32>
    %5 = vector.broadcast %4 : vector<4x1xf32> to vector<4x256xf32>
    %6 = arith.mulf %1, %5 : vector<4x256xf32>
    %c0_7 = arith.constant 0 : index
    %c0_8 = arith.constant 0 : index
    %7 = vector.load %arg5[%c0_7, %c0_8] : memref<4x1xf32, #tpu.memory_space<vmem>>, vector<4x1xf32>
    %8 = vector.broadcast %7 : vector<4x1xf32> to vector<4x256xf32>
    %9 = arith.mulf %3, %8 : vector<4x256xf32>
    %10 = arith.addf %6, %9 : vector<4x256xf32>
    %cst = arith.constant dense<0.000000e+00> : vector<256xf32>
    %11 = vector.multi_reduction <add>, %10, %cst [0] : vector<4x256xf32> to vector<256xf32>
    %12 = vector.shape_cast %11 : vector<256xf32> to vector<1x256xf32>
    %c0_9 = arith.constant 0 : index
    %c0_10 = arith.constant 0 : index
    %13 = vector.load %arg6[%c0_9, %c0_10] : memref<1x1xf32, #tpu.memory_space<vmem>>, vector<1x1xf32>
    %14 = vector.broadcast %13 : vector<1x1xf32> to vector<1x256xf32>
    %15 = arith.addf %12, %14 : vector<1x256xf32>
    %cst_11 = arith.constant 0.000000e+00 : f32
    %16 = vector.broadcast %cst_11 : f32 to vector<1x256xf32>
    %17 = arith.subf %16, %15 : vector<1x256xf32>
    %18 = math.exp %17 : vector<1x256xf32>
    %cst_12 = arith.constant 1.000000e+00 : f32
    %19 = vector.broadcast %cst_12 : f32 to vector<1x256xf32>
    %20 = arith.addf %19, %18 : vector<1x256xf32>
    %cst_13 = arith.constant 1.000000e+00 : f32
    %21 = vector.broadcast %cst_13 : f32 to vector<1x256xf32>
    %22 = arith.divf %21, %20 : vector<1x256xf32>
    %23 = arith.subf %1, %3 : vector<4x256xf32>
    %24 = vector.broadcast %22 : vector<1x256xf32> to vector<4x256xf32>
    %25 = arith.mulf %24, %23 : vector<4x256xf32>
    %26 = arith.addf %3, %25 : vector<4x256xf32>
    %c0_14 = arith.constant 0 : index
    %c0_15 = arith.constant 0 : index
    %c0_16 = arith.constant 0 : index
    %c0_17 = arith.constant 0 : index
    %27 = vector.load %arg7[%c0_14, %c0_15, %c0_16, %c0_17] : memref<1x3x4x256xf32, #tpu.memory_space<vmem>>, vector<1x1x4x256xf32>
    %28 = vector.shape_cast %27 : vector<1x1x4x256xf32> to vector<4x256xf32>
    %29 = vector.shape_cast %26 : vector<4x256xf32> to vector<1x1x4x256xf32>
    tpu.vector_store %arg7[%c0_14, %c0_15, %c0_16, %c0_17], %29 {strides = array<i32>} : memref<1x3x4x256xf32, #tpu.memory_space<vmem>>, vector<1x1x4x256xf32>,
    %c0_18 = arith.constant 0 : index
    %c1 = arith.constant 1 : index
    %c0_19 = arith.constant 0 : index
    %c0_20 = arith.constant 0 : index
    %30 = vector.load %arg7[%c0_18, %c1, %c0_19, %c0_20] : memref<1x3x4x256xf32, #tpu.memory_space<vmem>>, vector<1x1x4x256xf32>
    %31 = vector.shape_cast %30 : vector<1x1x4x256xf32> to vector<4x256xf32>
    %32 = vector.shape_cast %1 : vector<4x256xf32> to vector<1x1x4x256xf32>
    tpu.vector_store %arg7[%c0_18, %c1, %c0_19, %c0_20], %32 {strides = array<i32>} : memref<1x3x4x256xf32, #tpu.memory_space<vmem>>, vector<1x1x4x256xf32>,
    %c0_21 = arith.constant 0 : index
    %c2 = arith.constant 2 : index
    %c0_22 = arith.constant 0 : index
    %c0_23 = arith.constant 0 : index
    %33 = vector.load %arg7[%c0_21, %c2, %c0_22, %c0_23] : memref<1x3x4x256xf32, #tpu.memory_space<vmem>>, vector<1x1x4x256xf32>
    %34 = vector.shape_cast %33 : vector<1x1x4x256xf32> to vector<4x256xf32>
    %35 = vector.shape_cast %3 : vector<4x256xf32> to vector<1x1x4x256xf32>
    tpu.vector_store %arg7[%c0_21, %c2, %c0_22, %c0_23], %35 {strides = array<i32>} : memref<1x3x4x256xf32, #tpu.memory_space<vmem>>, vector<1x1x4x256xf32>,
    return
  }
  func.func @transform_0(%arg0: i32, %arg1: i32) -> (i32, i32, i32) {
    %c0_i32 = arith.constant 0 : i32
    %c0_i32_0 = arith.constant 0 : i32
    return %arg0, %c0_i32, %arg1 : i32, i32, i32
  }
  func.func @transform_1(%arg0: i32, %arg1: i32) -> (i32, i32, i32) {
    %c0_i32 = arith.constant 0 : i32
    %c0_i32_0 = arith.constant 0 : i32
    return %arg0, %c0_i32, %arg1 : i32, i32, i32
  }
  func.func @transform_2(%arg0: i32, %arg1: i32) -> (i32, i32) {
    %c0_i32 = arith.constant 0 : i32
    %c0_i32_0 = arith.constant 0 : i32
    %c0_i32_1 = arith.constant 0 : i32
    return %c0_i32, %c0_i32_0 : i32, i32
  }
  func.func @transform_3(%arg0: i32, %arg1: i32) -> (i32, i32) {
    %c0_i32 = arith.constant 0 : i32
    %c0_i32_0 = arith.constant 0 : i32
    %c0_i32_1 = arith.constant 0 : i32
    return %c0_i32, %c0_i32_0 : i32, i32
  }
  func.func @transform_4(%arg0: i32, %arg1: i32) -> (i32, i32) {
    %c0_i32 = arith.constant 0 : i32
    %c0_i32_0 = arith.constant 0 : i32
    %c0_i32_1 = arith.constant 0 : i32
    return %c0_i32, %c0_i32_0 : i32, i32
  }
  func.func @transform_5(%arg0: i32, %arg1: i32) -> (i32, i32, i32, i32) {
    %c0_i32 = arith.constant 0 : i32
    %c0_i32_0 = arith.constant 0 : i32
    %c0_i32_1 = arith.constant 0 : i32
    return %arg0, %c0_i32, %c0_i32_0, %arg1 : i32, i32, i32, i32
  }
}

</mosaic_0001>

<bundles_post_ra>
// kernel: tpu_custom_call.1
= control target key start
LH: loop header
LB: loop body
LE: loop exit
PB: predicated region body
PF: predicated region fallthrough
CT: control target
= control target key end

     0   :  { %s950_s0 = inlined_call_operand.hbm [shape: f32[2,4,256], index: 0, kind: input, shape index: {}]   ;;  %s951_s1 = inlined_call_operand.vmem [shape: f32[2,4,256], index: 1, kind: input, shape index: {}]   ;;  %s952_s2 = inlined_call_operand.vmem [shape: f32[4,1], index: 2, kind: input, shape index: {}]   ;;  %s953_s3 = inlined_call_operand.vmem [shape: f32[4,1], index: 3, kind: input, shape index: {}]   ;;  %s954_s4 = inlined_call_operand.<no memory space> [shape: f32[1,1], index: 4, kind: input, shape index: {}]   ;;  %s955_s5 = inlined_call_operand.hbm [shape: f32[2,3,4,256], index: 5, kind: output, shape index: {}]  }
   0x1   :  { %v10_v0 = vstv %s954_s4 }
   0x2   :  { %11 = vst [vmem:[#allocation2] sm:$0x1] %v10_v0 }
   0x3   :  { %12 = vsyncpa [#allocation4], 0 }
   0x4   :  { %14 = vsyncpa [#allocation4 + $0x1], 0 }
   0x5   :  { %15 = vsyncpa [#allocation5], 0 }
   0x6   :  { %17 = vsyncpa [#allocation5 + $0x1], 0  ;;  %s758_s20 = smov 0   ;;  %s760_s21 = smov 0  }
   0x7   :  { %s762_s22 = smov 0   ;;  %s764_s23 = smov 0  }
   0x8   :  { %s766_s24 = smov 0   ;;  %s768_s25 = smov 0  }
   0x9 LB: > { %s509_s4 = sadd.s32 4294967295, %s717_s25   ;;  %s510_s26 = sadd.s32 4294967294, %s717_s25   ;;  %s717_s25 = sphi %s768_s25, %s23_s25   ;;  %s713_s24 = sphi %s766_s24, %s971_s24   ;;  %s709_s23 = sphi %s764_s23, %s970_s23   ;;  %s705_s22 = sphi %s762_s22, %s969_s22   ;;  %s701_s21 = sphi %s760_s21, %s968_s21   ;;  %s697_s20 = sphi %s758_s20, %s967_s20  }
   0xa   : > { %s35_s27 = sadd.s32 1, %s713_s24  ;;  %s44_s28 = sadd.s32 1, %s705_s22 }
   0xb   : > { %p37_p0 = scmp.ge.s32.totalorder %s35_s27, 2  ;;  %p51_p1 = scmp.ne.s32.totalorder %s705_s22, %s701_s21 }
   0xc   : > { %p52_p2 = scmp.eq.s32.totalorder %s717_s25, 0  ;;  %p57_p3 = scmp.ne.s32.totalorder %s701_s21, %s697_s20 }
   0xd   : > { %s973_s27 = smov (%p37_p0, %s35_s27), 0  ;;  %p58_p5 = scmp.eq.s32.totalorder %s509_s4, 0 }
   0xe   : > { %p799_p4 = por %p52_p2, %p51_p1  ;;  %s39_s30 = ssub.s32 %s713_s24, %s973_s27 }
   0xf   : > { %p174_p6 = scmp.eq.s32.totalorder %s509_s4, 1  ;;  %p42_p7 = scmp.eq.s32.totalorder %s39_s30, 0 }
  0x10   : > { %p805_p8 = por %p58_p5, %p57_p3  ;;  %p180_p10 = scmp.eq.s32.totalorder %s510_s26, 1 }
  0x11   : > { %p809_p9 = por %p174_p6, %p51_p1  ;;  %p541_p13 = scmp.lt.s32.totalorder %s717_s25, 2 }
  0x12   : > { %s814_s8 = scalar_select %p42_p7, %s705_s22, %s44_s28  }
  0x13   : > { %s959_s7 = scalar_select %p809_p9, 1, 0 }
  0x14   : > { %p816_p11 = por %p180_p10, %p57_p3  ;;  %s209_s10 = sand.u32 1, %s705_s22  }
  0x15   : > { %s513_s11 = sshll.u32 %s209_s10, 3  ;;  %s525_s12 = sshll.u32 %s713_s24, 7 }
  0x16   : > { %s960_s9 = scalar_select %p816_p11, 1, 0 }
  0x17   : > { %s827_s15 = scalar_lea.hbm %s950_s0, %s525_s12  ;;  %s213_s16 = scalar_lea.vmem [#allocation3], %s513_s11 }
  0x18   : > { %s223_s17 = sshll.u32 %s213_s16, 4  ;;  %p833_p0 = pnand %p541_p13, %p799_p4  ;;  %s829_s17 = int_to_ptr.vmem [resolvable:$true] %s223_s17 }
  0x19   : > { %s210_s19 = scalar_lea.sflag [#allocation4], %s209_s10  ;;  %s605_s4 = scalar_lea.hbm %s827_s15, 128 }
  0x1a   : > { %p606_p3 = scmp.ne.s32.totalorder %s827_s15, %s605_s4  ;;  %p607_p5 = pneg %p833_p0 }
  0x1b   : > { %s610_s29 = scalar_lea.hbm %s950_s0, 256  ;;  %p611_p4 = scmp.lt.u32.totalorder %s827_s15, %s950_s0 }
  0x1c   : > { %p608_p6 = pnand %p607_p5, %p606_p3  ;;  %p612_p10 = scmp.lt.u32.totalorder %s610_s29, %s605_s4 }
  0x1d   : > { %p614_p12 = scmp.lt.u32.totalorder %s605_s4, %s827_s15 }
  0x1e   : > { %p609_p7 = pneg %p608_p6  ;;  %p613_p13 = por %p612_p10, %p611_p4 }
  0x20   : > { %p615_p1 = por %p614_p12, %p613_p13 }
  0x22   : > { %p616_p2 = pnand %p615_p1, %p609_p7 }
  0x24   : > { %619 = shalt.err (!%p616_p2)
}
  0x25   : > { %s620_s10 = scalar_lea.vmem %s829_s17, 128  ;;  %s719_s12 = smov [#allocation3]  }
  0x26   : > { %p621_p3 = scmp.ne.s32.totalorder %s829_s17, %s620_s10  ;;  %s625_s13 = sshll.u32 %s719_s12, 4  ;;  %s626_s13 = int_to_ptr.vmem [resolvable:$false] %s625_s13 }
  0x27   : > { %s627_s14 = scalar_lea.vmem %s626_s13, 256  ;;  %p628_p9 = scmp.lt.s32.totalorder %s829_s17, %s626_s13 }
  0x28   : > { %p623_p6 = pnand %p621_p3, %p607_p5  ;;  %p629_p4 = scmp.lt.s32.totalorder %s627_s14, %s620_s10 }
  0x2a   : > { %p624_p11 = pneg %p623_p6  ;;  %p630_p10 = por %p629_p4, %p628_p9 }
  0x2c   : > { %p631_p12 = pnand %p630_p10, %p624_p11 }
  0x2e   : > { %634 = shalt.err (!%p631_p12)
}
  0x2f   : > { %536 = dma.hbm_to_vmem [thread:$0]  (!%p833_p0), %s827_s15, 128, %s829_s17, %s210_s19  }
  0x30   : > { %p962_p1 = scmp.lt.s32.totalorder %s717_s25, 3  ;;  %p963_p2 = scmp.ge.s32.totalorder %s717_s25, 1 }
  0x32   : > { %p242_p5 = pnand %p963_p2, %p962_p1 }
  0x33   : > { %s869_s16 = sand.u32 (!%p242_p5), 1, %s701_s21  }
  0x34   : > { %245 = sbr.rel (%p242_p5) target bundleno = 266 (0x10a), region = 40  ;;  %s517_s4 = sshll.u32 (!%p242_p5), %s869_s16, 3 }
  0x35   : > { %s248_s26 = scalar_lea.sflag (!%p242_p5), [#allocation4], %s869_s16  ;;  %s251_s28 = scalar_lea.vmem (!%p242_p5), [#allocation3], %s517_s4 }
  0x3b   : > { %688 = dma.done.wait (%p805_p8), %s248_s26, 128  }
  0x3c   : > { %690 = vsyncadd (%p805_p8), %s248_s26, 4294967168  ;;  %v720_v1 = vmov 0   ;;  %s527_s15 = smul.u32 24, %s869_s16  ;;  %v301_v2 = vld [vmem:[%s952_s2] sm:$0xf]  ;;  %p289_p9 = scmp.lt.s32.totalorder %s709_s23, 1  ;;  %v309_v9 = vlaneseq }
  0x3d   : > { %595 = vset.pattern.permute.xlu0 %v720_v1  ;;  %596 = vset.pattern.permute.xlu1 %v720_v1  ;;  %v348_v3 = vld [vmem:[#allocation2] sm:$0x1]  ;;  %v299_v4 = vld [vmem:[%s251_s28] sm:$0xff]  ;;  %v721_v7 = vmov 839922192   ;;  %vm333_vm0 = vcmask 1043456  }
  0x3e   : > { %304 = vperm.xlu0 %595, %v301_v2   ;;  %351 = vperm.xlu1 %596, %v348_v3   ;;  %v315_v5 = vld [vmem:[%s953_s3] sm:$0xf]  ;;  %s885_s6 = scalar_lea.vmem [#allocation6], %s527_s15  ;;  %v307_v8 = vunpack.c.l.s4 %v721_v7  ;;  %v310_v11 = vshrl.u32 %v309_v9, 7  ;;  %s528_s4 = smul.u32 384, %s709_s23 }
  0x3f   : > { %520 = vst [vmem:[%s885_s6 + $0x8] sm:$0xff] %v299_v4  ;;  %s290_s30 = scalar_select %p289_p9, %s709_s23, 1 }
  0x40   : > { %v308_v10 = vunpack.c.0.s8 %v307_v8  ;;  %v356_v26 = vsub.s32 0, %v310_v11  ;;  %s404_s14 = sshll.u32 %s885_s6, 4  ;;  %s900_s15 = scalar_lea.hbm %s955_s5, %s528_s4  ;;  %s895_s14 = int_to_ptr.vmem [resolvable:$true] %s404_s14 }
  0x41   : > { %s526_s11 = sshll.u32 %s290_s30, 3  ;;  %s389_s17 = scalar_lea.sflag [#allocation5], %s869_s16 }
  0x42   : > { %318 = vperm.xlu0 %595, %v315_v5   ;;  %s296_s13 = scalar_lea.vmem %s951_s1, %s526_s11  ;;  %v311_v12 = vsub.s32 %v308_v10, %v310_v11  ;;  %s635_s18 = scalar_lea.vmem %s895_s14, 384 }
  0x43   : > { %v300_v6 = vld [vmem:[%s296_s13] sm:$0xff]  ;;  %p636_p8 = scmp.ne.s32.totalorder %s895_s14, %s635_s18  ;;  %p964_p11 = scmp.ne.s32.totalorder %s959_s7, 0 }
  0x44   : > { %521 = vst [vmem:[%s885_s6 + $0x10] sm:$0xff] %v300_v6  ;;  %v372_v48 = vsub.f32 %v299_v4, %v300_v6  ;;  %s722_s23 = smov [#allocation6]  }
  0x45   : > { %p637_p0 = pnand %p636_p8, %p964_p11  ;;  %s639_s19 = sshll.u32 %s722_s23, 4  ;;  %s640_s19 = int_to_ptr.vmem [resolvable:$false] %s639_s19 }
  0x46   : > { %v374_v49 = vcombine.high %v372_v48, %v372_v48  ;;  %s641_s29 = scalar_lea.vmem %s640_s19, 768  ;;  %p642_p13 = scmp.lt.s32.totalorder %s895_s14, %s640_s19 }
  0x47   : > { %p638_p7 = pneg %p637_p0  ;;  %p643_p3 = scmp.lt.s32.totalorder %s641_s29, %s635_s18 }
  0x49   : > { %p644_p6 = por %p643_p3, %p642_p13 }
  0x4b   : > { %p645_p4 = pnand %p644_p6, %p638_p7 }
  0xbd   : > { %v305_v13 = vpop.permute.xlu0 %304  ;;  %v352_v29 = vpop.permute.xlu1 %351 }
  0xbe   : > { %v312_v14 = vrot.slane %v305_v13, %v311_v12  ;;  %v357_v34 = vrot.slane %v352_v29, %v356_v26 }
  0xc0   : > { %v314_v17 = vmul.f32 %v312_v14, %v299_v4 }
  0xc1   : > { %v319_v15 = vpop.permute.xlu0 %318 }
  0xc2   : > { %v326_v16 = vrot.slane %v319_v15, %v311_v12 }
  0xc4   : > { %v328_v18 = vmul.f32 %v326_v16, %v300_v6 }
  0xc6   : > { %v329_v19 = vadd.f32 %v328_v18, %v314_v17 }
  0xc8   : > { %v331_v20 = vcombine.high %v329_v19, %v329_v19  ;;  %v334_v21 = vsel %vm333_vm0, %v329_v19, 0.0 }
  0xc9   : > { %v335_v22 = vrot.slane %v334_v21, 4 }
  0xca   : > { %v341_v23 = vsel %vm333_vm0, %v331_v20, 0.0 }
  0xcb   : > { %v336_v24 = vadd.f32 %v335_v22, %v334_v21  ;;  %v342_v25 = vrot.slane %v341_v23, 4 }
  0xcd   : > { %v337_v27 = vrot.slane %v336_v24, 2  ;;  %v343_v28 = vadd.f32 %v342_v25, %v341_v23 }
  0xcf   : > { %v338_v30 = vadd.f32 %v337_v27, %v336_v24  ;;  %v344_v31 = vrot.slane %v343_v28, 2 }
  0xd1   : > { %v339_v32 = vrot.slane %v338_v30, 1  ;;  %v345_v33 = vadd.f32 %v344_v31, %v343_v28 }
  0xd3   : > { %v340_v35 = vadd.f32 %v339_v32, %v338_v30  ;;  %v346_v36 = vrot.slane %v345_v33, 1 }
  0xd5   : > { %v347_v37 = vadd.f32 %v346_v36, %v345_v33  ;;  %v358_v38 = vadd.f32 %v357_v34, %v340_v35 }
  0xd7   : > { %v359_v39 = vadd.f32 %v357_v34, %v347_v37  ;;  %v360_v40 = vsub.f32 0.0, %v358_v38 }
  0xd9   : > { %v361_v41 = vsub.f32 0.0, %v359_v39  ;;  %v362_v42 = vmul.f32 1.442695, %v360_v40 }
  0xdb   : > { %597 = vpow2.f32 %v362_v42  ;;  %v364_v43 = vmul.f32 1.442695, %v361_v41 }
  0xdd   : > { %599 = vpow2.f32 %v364_v43 }
  0xe5   : > { %v598_v44 = vpop.eup %597 }
  0xe6   : > { %v366_v45 = vadd.f32 1.0, %v598_v44 }
  0xe7   : > { %v600_v46 = vpop.eup %599 }
  0xe8   : > { %v367_v47 = vadd.f32 1.0, %v600_v46  ;;  %601 = vrcp.f32 %v366_v45 }
  0xea   : > { %603 = vrcp.f32 %v367_v47 }
  0xf2   : > { %v602_v50 = vpop.eup %601 }
  0xf3   : > { %v376_v52 = vmul.f32 %v602_v50, %v372_v48 }
  0xf4   : > { %v604_v51 = vpop.eup %603 }
  0xf5   : > { %v377_v53 = vmul.f32 %v604_v51, %v374_v49 }
  0xf7   : > { %v380_v54 = vcombine.low %v376_v52, %v377_v53 }
  0xf9   : > { %v382_v55 = vadd.f32 %v380_v54, %v300_v6 }
  0xfb   : > { %383 = vst [vmem:[%s885_s6] sm:$0xff] %v382_v55 }
  0xfc   : > { %648 = shalt.err (!%p645_p4)
}
  0xfd   : > { %s649_s6 = scalar_lea.hbm %s900_s15, 384  ;;  %s653_s10 = scalar_lea.hbm %s955_s5, 768 }
  0xfe   : > { %p650_p10 = scmp.ne.s32.totalorder %s900_s15, %s649_s6  ;;  %p654_p2 = scmp.lt.u32.totalorder %s900_s15, %s955_s5 }
  0xff   : > { %p655_p5 = scmp.lt.u32.totalorder %s653_s10, %s649_s6  ;;  %p657_p8 = scmp.lt.u32.totalorder %s649_s6, %s900_s15 }
 0x100   : > { %p651_p12 = pnand %p650_p10, %p964_p11 }
 0x101   : > { %p656_p9 = por %p655_p5, %p654_p2 }
 0x102   : > { %p652_p1 = pneg %p651_p12 }
 0x103   : > { %p658_p0 = por %p657_p8, %p656_p9 }
 0x105   : > { %p659_p7 = pnand %p658_p0, %p652_p1 }
 0x107   : > { %662 = shalt.err (!%p659_p7)
}
 0x108   : > { %s723_s4 = smov 128   ;;  %s724_s26 = smov 8  }
 0x109   : > { %531 = dma.vmem_to_hbm [thread:$0]  (%p964_p11), %s895_s14, 384, %s900_s15, %s389_s17, %s723_s4, %s723_s4, %s724_s26  }
 0x10a PF: > { %s419_s28 = sand.u32 1, %s697_s20   ;;  %p965_p13 = scmp.ne.s32.totalorder %s960_s9, 0 }
 0x10b   : > { %p966_p3 = scmp.ge.s32.totalorder %s717_s25, 2  ;;  %s420_s18 = scalar_lea.sflag [#allocation5], %s419_s28 }
 0x10d   : > { %p538_p6 = pnand %p966_p3, %p965_p13 }
 0x10f   : > { %692 = dma.done.wait (!%p538_p6), %s420_s18, 384  }
 0x110   : > { %694 = vsyncadd (!%p538_p6), %s420_s18, 4294966912  ;;  %s23_s25 = sadd.s32 1, %s717_s25   ;;  %s967_s20 = smov %s701_s21 }
 0x111   : > { %p20_p4 = scmp.ge.s32.totalorder %s23_s25, 4   ;;  %s968_s21 = smov %s705_s22 }
 0x112   : > { %s969_s22 = smov %s814_s8  ;;  %s970_s23 = smov %s713_s24 }
 0x113   : > { %s971_s24 = smov %s973_s27  ;;  %22 = sbr.rel (!%p20_p4) target bundleno = 9 (0x9), region = 90 }
 0x11a   :  { %425 = vsyncpa [#allocation4], 1 }
 0x11b   :  { %427 = vsyncpa [#allocation4 + $0x1], 1 }
 0x11c   :  { %428 = vsyncpa [#allocation5], 1 }
 0x11d   :  { %430 = vsyncpa [#allocation5 + $0x1], 1 }

</bundles_post_ra>
